<compile_context>
chip_gen: v6e
topology: v6e:2x2x1
jax: 0.10.0
libtpu: 0.0.40
codegen_flags: <defaults>
</compile_context>

<pallas_src>
import functools

import jax
import jax.numpy as jnp
from jax.experimental import pallas as pl
from jax.experimental.pallas import tpu as pltpu


def _round_up(x, m):
    return ((x + m - 1) // m) * m


def _choose_tile(B, tb):
    """Pick (TB, B_pad).

    Constraints:
      * TB is a multiple of 16 (bf16 sublane packing of the (TB, 4E) block).
      * Either TB is a multiple of 128 or TB == B_pad, so the lane-dense
        (1, TB) output block over a (1, B_pad) array satisfies Mosaic's
        last-dim divisibility rule.
      * Large batches are split into >=2 lane-aligned tiles (feeds both
        TensorCores on v7x via the "parallel" batch axis).
    """
    b16 = _round_up(B, 16)
    if b16 <= 256 and b16 <= tb:
        return b16, b16                       # single small tile
    tile = max(128, (min(tb, b16) // 128) * 128)
    return tile, _round_up(B, tile)


def neumf_kernel(
    emb_ref,
    w1u_ref, w1i_ref, b1_ref, w2_ref, b2_ref, w3_ref, b3_ref,
    wpg_ref, wpm_ref, bp_ref,
    out_ref,
    *, embedding_dim,
):
    f32 = jnp.float32
    bf16 = jnp.bfloat16
    E = embedding_dim

    # Fused activation block: columns are [gmf_u | mlp_u | gmf_i | mlp_i].
    emb = emb_ref[...]                                        # (TB, 4E) bf16
    gmf_u = emb[:, 0 * E:1 * E]
    mlp_u = emb[:, 1 * E:2 * E]
    gmf_i = emb[:, 2 * E:3 * E]
    mlp_i = emb[:, 3 * E:4 * E]

    # GMF branch, reduced immediately (VPU multiply + lane reduction) so only a
    # (TB, 1) partial logit stays live across the MLP matmuls.
    gmf = gmf_u.astype(f32) * gmf_i.astype(f32)               # (TB, E) f32
    logit = jnp.sum(gmf * wpg_ref[...], axis=-1, keepdims=True)   # (TB, 1)

    # MLP branch: bf16 MXU matmuls with f32 accumulation.  Layer 1 is split so
    # concat([mlp_u, mlp_i]) never needs to exist.
    h = (jnp.dot(mlp_u, w1u_ref[...], preferred_element_type=f32)
         + jnp.dot(mlp_i, w1i_ref[...], preferred_element_type=f32)
         + b1_ref[...])
    h = jnp.maximum(h, 0.0)
    # TODO(synk): nn.Dropout treated as identity (inference-mode forward).
    h = jnp.dot(h.astype(bf16), w2_ref[...], preferred_element_type=f32) + b2_ref[...]
    h = jnp.maximum(h, 0.0)
    h = jnp.dot(h.astype(bf16), w3_ref[...], preferred_element_type=f32) + b3_ref[...]
    h = jnp.maximum(h, 0.0)                                   # (TB, d3) f32

    logit = logit + jnp.sum(h * wpm_ref[...], axis=-1, keepdims=True)  # (TB, 1)

    # Lane-dense store: move the column to a (1, TB) row (XLU transpose, that
    # slot is otherwise idle) so the output write is a full-width vst.
    row = jnp.transpose(logit, (1, 0))                        # (1, TB)
    out_ref[...] = jax.nn.sigmoid(row + bp_ref[...])


def neumf_forward(params, user, item, *, tb=1024):
    user_table = params["user_table"]     # (num_users, 2E) bf16, [gmf | mlp]
    item_table = params["item_table"]     # (num_items, 2E) bf16, [gmf | mlp]
    E = user_table.shape[1] // 2

    B = user.shape[0]
    TB, B_pad = _choose_tile(B, tb)
    if B_pad != B:
        # Padded rows gather row 0; their outputs are sliced away below.
        user = jnp.pad(user, (0, B_pad - B))
        item = jnp.pad(item, (0, B_pad - B))

    # --- glue: 2 fused-table gathers + one concat -> a single near-lane-dense
    # (B_pad, 4E=120) bf16 activation stream for the kernel. ---
    u_emb = jnp.take(user_table, user, axis=0)                # (B_pad, 2E) bf16
    i_emb = jnp.take(item_table, item, axis=0)                # (B_pad, 2E) bf16
    emb = jnp.concatenate([u_emb, i_emb], axis=-1)            # (B_pad, 4E) bf16

    grid = (B_pad // TB,)

    def const_spec(shape):                # VMEM-resident parameter (fetched once)
        return pl.BlockSpec(shape, lambda i: (0, 0))

    in_specs = [
        pl.BlockSpec((TB, 4 * E), lambda i: (i, 0)),          # fused activations
        const_spec(params["w1_u"].shape),
        const_spec(params["w1_i"].shape),
        const_spec(params["b1"].shape),
        const_spec(params["w2"].shape),
        const_spec(params["b2"].shape),
        const_spec(params["w3"].shape),
        const_spec(params["b3"].shape),
        const_spec(params["wp_g"].shape),
        const_spec(params["wp_m"].shape),
        const_spec(params["bp"].shape),
    ]

    out = pl.pallas_call(
        functools.partial(neumf_kernel, embedding_dim=E),
        out_shape=jax.ShapeDtypeStruct((1, B_pad), jnp.float32),
        grid_spec=pltpu.PrefetchScalarGridSpec(
            num_scalar_prefetch=0,
            grid=grid,
            in_specs=in_specs,
            out_specs=pl.BlockSpec((1, TB), lambda i: (0, i)),
        ),
        compiler_params=pltpu.CompilerParams(
            # Batch axis is independent -> parallel (sharded over 2 TCs on v7x
            # whenever grid >= 2; neutral on v5e/v6e).  Per-tile footprint is
            # well under the limit on every generation.
            dimension_semantics=("parallel",),
            vmem_limit_bytes=32 * 1024 * 1024,
        ),
    )(
        emb,
        params["w1_u"], params["w1_i"], params["b1"],
        params["w2"], params["b2"],
        params["w3"], params["b3"],
        params["wp_g"], params["wp_m"], params["bp"],
    )

    # torch .squeeze() on (B, 1) -> (B,); drop batch padding.
    return out.reshape(-1)[:B]


def init_params(key, num_users, num_items, embedding_dim=30, mlp_dims=(64, 32, 16)):
    keys = jax.random.split(key, 8)
    E = embedding_dim
    d1, d2, d3 = mlp_dims

    def xavier_t(k, fan_out, fan_in):
        # torch xavier_uniform_ on weight (out, in); stored transposed (in, out) for x @ W.
        limit = float(jnp.sqrt(6.0 / (fan_in + fan_out)))
        return jax.random.uniform(k, (fan_in, fan_out), jnp.float32,
                                  minval=-limit, maxval=limit)

    gmf_u = 0.01 * jax.random.normal(keys[0], (num_users, E), jnp.float32)
    gmf_i = 0.01 * jax.random.normal(keys[1], (num_items, E), jnp.float32)
    mlp_u = 0.01 * jax.random.normal(keys[2], (num_users, E), jnp.float32)
    mlp_i = 0.01 * jax.random.normal(keys[3], (num_items, E), jnp.float32)

    w1 = xavier_t(keys[4], d1, 2 * E)              # (2E, d1)
    wp = xavier_t(keys[7], 1, E + d3)              # (E + d3, 1)

    return {
        # Fused embedding tables ([gmf | mlp] per row), bf16 to halve gather bytes.
        "user_table": jnp.concatenate([gmf_u, mlp_u], axis=1).astype(jnp.bfloat16),
        "item_table": jnp.concatenate([gmf_i, mlp_i], axis=1).astype(jnp.bfloat16),
        # Layer-1 weight pre-split (user half / item half) so the kernel never
        # needs concat([mlp_u, mlp_i]).  MLP weights bf16 (MXU-native), biases f32.
        "w1_u": w1[:E].astype(jnp.bfloat16),
        "w1_i": w1[E:].astype(jnp.bfloat16),
        "b1": jnp.zeros((1, d1), jnp.float32),
        "w2": xavier_t(keys[5], d2, d1).astype(jnp.bfloat16),
        "b2": jnp.zeros((1, d2), jnp.float32),
        "w3": xavier_t(keys[6], d3, d2).astype(jnp.bfloat16),
        "b3": jnp.zeros((1, d3), jnp.float32),
        # Predict-layer weight kept f32 as lane-dense rows (used via VPU reduce).
        "wp_g": wp[:E].T,                          # (1, E)
        "wp_m": wp[E:].T,                          # (1, d3)
        "bp": jnp.zeros((1, 1), jnp.float32),
    }


def neumf_reference(params, user, item):
    """Pure-JAX (f32) reference mirroring the PyTorch forward in eval mode."""
    E = params["user_table"].shape[1] // 2
    u = params["user_table"][user].astype(jnp.float32)
    i = params["item_table"][item].astype(jnp.float32)
    gmf = u[:, :E] * i[:, :E]
    x = jnp.concatenate([u[:, E:], i[:, E:]], axis=-1)
    w1 = jnp.concatenate([params["w1_u"], params["w1_i"]], axis=0).astype(jnp.float32)
    x = jnp.maximum(x @ w1 + params["b1"], 0.0)
    x = jnp.maximum(x @ params["w2"].astype(jnp.float32) + params["b2"], 0.0)
    x = jnp.maximum(x @ params["w3"].astype(jnp.float32) + params["b3"], 0.0)
    logit = (jnp.sum(gmf * params["wp_g"], axis=-1, keepdims=True)
             + jnp.sum(x * params["wp_m"], axis=-1, keepdims=True)
             + params["bp"])
    return jnp.squeeze(jax.nn.sigmoid(logit), axis=-1)


if __name__ == "__main__":
    key = jax.random.PRNGKey(0)
    k_param, k_user, k_item = jax.random.split(key, 3)

    num_users, num_items = 50, 40
    params = init_params(k_param, num_users, num_items)

    # Small batch (single tile, TB == B_pad).
    batch = 8
    user = jax.random.randint(k_user, (batch,), 0, num_users, dtype=jnp.int32)
    item = jax.random.randint(k_item, (batch,), 0, num_items, dtype=jnp.int32)
    out = neumf_forward(params, user, item)
    jax.block_until_ready(out)
    ref = neumf_reference(params, user, item)
    assert out.shape == (batch,)
    assert jnp.allclose(out, ref, atol=2e-2), float(jnp.max(jnp.abs(out - ref)))

    # Larger, non-multiple-of-tile batch: exercises 128-aligned batch tiling,
    # padding, and a multi-step "parallel" grid.
    batch2 = 300
    k_u2, k_i2 = jax.random.split(k_user)
    user2 = jax.random.randint(k_u2, (batch2,), 0, num_users, dtype=jnp.int32)
    item2 = jax.random.randint(k_i2, (batch2,), 0, num_items, dtype=jnp.int32)
    out2 = neumf_forward(params, user2, item2, tb=128)
    jax.block_until_ready(out2)
    ref2 = neumf_reference(params, user2, item2)
    assert out2.shape == (batch2,)
    assert jnp.allclose(out2, ref2, atol=2e-2), float(jnp.max(jnp.abs(out2 - ref2)))

    print("KERNEL_OK")
</pallas_src>

<mosaic_0001>
module attributes {stable_mosaic.version = 11 : i64} {
  func.func @neumf_kernel(%arg0: i32, %arg1: memref<16x120xbf16, #tpu.memory_space<vmem>>, %arg2: memref<30x64xbf16, #tpu.memory_space<vmem>>, %arg3: memref<30x64xbf16, #tpu.memory_space<vmem>>, %arg4: memref<1x64xf32, #tpu.memory_space<vmem>>, %arg5: memref<64x32xbf16, #tpu.memory_space<vmem>>, %arg6: memref<1x32xf32, #tpu.memory_space<vmem>>, %arg7: memref<32x16xbf16, #tpu.memory_space<vmem>>, %arg8: memref<1x16xf32, #tpu.memory_space<vmem>>, %arg9: memref<1x30xf32, #tpu.memory_space<vmem>>, %arg10: memref<1x16xf32, #tpu.memory_space<vmem>>, %arg11: memref<1x1xf32, #tpu.memory_space<vmem>>, %arg12: memref<1x16xf32, #tpu.memory_space<vmem>>) attributes {dimension_semantics = [#tpu.dimension_semantics<parallel>], iteration_bounds = array<i64: 1>, scalar_prefetch = 0 : i64, scratch_operands = 0 : i64, tpu.core_type = #tpu.core_type<tc>, window_params = [{transform_indices = @transform_0, window_bounds = array<i64: 16, 120>}, {pipeline_mode = #tpu.pipeline_mode<synchronous>, transform_indices = @transform_1, window_bounds = array<i64: 30, 64>}, {pipeline_mode = #tpu.pipeline_mode<synchronous>, transform_indices = @transform_2, window_bounds = array<i64: 30, 64>}, {pipeline_mode = #tpu.pipeline_mode<synchronous>, transform_indices = @transform_3, window_bounds = array<i64: 1, 64>}, {pipeline_mode = #tpu.pipeline_mode<synchronous>, transform_indices = @transform_4, window_bounds = array<i64: 64, 32>}, {pipeline_mode = #tpu.pipeline_mode<synchronous>, transform_indices = @transform_5, window_bounds = array<i64: 1, 32>}, {pipeline_mode = #tpu.pipeline_mode<synchronous>, transform_indices = @transform_6, window_bounds = array<i64: 32, 16>}, {pipeline_mode = #tpu.pipeline_mode<synchronous>, transform_indices = @transform_7, window_bounds = array<i64: 1, 16>}, {pipeline_mode = #tpu.pipeline_mode<synchronous>, transform_indices = @transform_8, window_bounds = array<i64: 1, 30>}, {pipeline_mode = #tpu.pipeline_mode<synchronous>, transform_indices = @transform_9, window_bounds = array<i64: 1, 16>}, {pipeline_mode = #tpu.pipeline_mode<synchronous>, transform_indices = @transform_10, window_bounds = array<i64: 1, 1>}, {transform_indices = @transform_11, window_bounds = array<i64: 1, 16>}]} {
    %c0 = arith.constant 0 : index
    %c0_0 = arith.constant 0 : index
    %0 = vector.load %arg1[%c0, %c0_0] : memref<16x120xbf16, #tpu.memory_space<vmem>>, vector<16x120xbf16>
    %1 = vector.extract_strided_slice %0 {offsets = [0, 0], sizes = [16, 30], strides = [1, 1]} : vector<16x120xbf16> to vector<16x30xbf16>
    %2 = vector.extract_strided_slice %0 {offsets = [0, 30], sizes = [16, 30], strides = [1, 1]} : vector<16x120xbf16> to vector<16x30xbf16>
    %3 = vector.extract_strided_slice %0 {offsets = [0, 60], sizes = [16, 30], strides = [1, 1]} : vector<16x120xbf16> to vector<16x30xbf16>
    %4 = vector.extract_strided_slice %0 {offsets = [0, 90], sizes = [16, 30], strides = [1, 1]} : vector<16x120xbf16> to vector<16x30xbf16>
    %5 = arith.extf %1 : vector<16x30xbf16> to vector<16x30xf32>
    %6 = arith.extf %3 : vector<16x30xbf16> to vector<16x30xf32>
    %7 = arith.mulf %5, %6 : vector<16x30xf32>
    %c0_1 = arith.constant 0 : index
    %c0_2 = arith.constant 0 : index
    %8 = vector.load %arg9[%c0_1, %c0_2] : memref<1x30xf32, #tpu.memory_space<vmem>>, vector<1x30xf32>
    %9 = vector.broadcast %8 : vector<1x30xf32> to vector<16x30xf32>
    %10 = arith.mulf %7, %9 : vector<16x30xf32>
    %cst = arith.constant dense<0.000000e+00> : vector<16xf32>
    %11 = vector.multi_reduction <add>, %10, %cst [1] : vector<16x30xf32> to vector<16xf32>
    %12 = vector.shape_cast %11 : vector<16xf32> to vector<16x1xf32>
    %c0_3 = arith.constant 0 : index
    %c0_4 = arith.constant 0 : index
    %13 = vector.load %arg2[%c0_3, %c0_4] : memref<30x64xbf16, #tpu.memory_space<vmem>>, vector<30x64xbf16>
    %cst_5 = arith.constant dense<0.000000e+00> : vector<16x64xf32>
    %14 = tpu.matmul %2, %13, %cst_5 {dimension_numbers = #tpu.dot_dimension_numbers<[1], [0], [0], [1], [0, 0, 1, 1], [], []>} : vector<16x30xbf16>, vector<30x64xbf16>, vector<16x64xf32> -> vector<16x64xf32>
    %c0_6 = arith.constant 0 : index
    %c0_7 = arith.constant 0 : index
    %15 = vector.load %arg3[%c0_6, %c0_7] : memref<30x64xbf16, #tpu.memory_space<vmem>>, vector<30x64xbf16>
    %cst_8 = arith.constant dense<0.000000e+00> : vector<16x64xf32>
    %16 = tpu.matmul %4, %15, %cst_8 {dimension_numbers = #tpu.dot_dimension_numbers<[1], [0], [0], [1], [0, 0, 1, 1], [], []>} : vector<16x30xbf16>, vector<30x64xbf16>, vector<16x64xf32> -> vector<16x64xf32>
    %17 = arith.addf %14, %16 : vector<16x64xf32>
    %c0_9 = arith.constant 0 : index
    %c0_10 = arith.constant 0 : index
    %18 = vector.load %arg4[%c0_9, %c0_10] : memref<1x64xf32, #tpu.memory_space<vmem>>, vector<1x64xf32>
    %19 = vector.broadcast %18 : vector<1x64xf32> to vector<16x64xf32>
    %20 = arith.addf %17, %19 : vector<16x64xf32>
    %cst_11 = arith.constant 0.000000e+00 : f32
    %21 = vector.broadcast %cst_11 : f32 to vector<16x64xf32>
    %22 = arith.maximumf %20, %21 : vector<16x64xf32>
    %23 = arith.truncf %22 : vector<16x64xf32> to vector<16x64xbf16>
    %c0_12 = arith.constant 0 : index
    %c0_13 = arith.constant 0 : index
    %24 = vector.load %arg5[%c0_12, %c0_13] : memref<64x32xbf16, #tpu.memory_space<vmem>>, vector<64x32xbf16>
    %cst_14 = arith.constant dense<0.000000e+00> : vector<16x32xf32>
    %25 = tpu.matmul %23, %24, %cst_14 {dimension_numbers = #tpu.dot_dimension_numbers<[1], [0], [0], [1], [0, 0, 1, 1], [], []>} : vector<16x64xbf16>, vector<64x32xbf16>, vector<16x32xf32> -> vector<16x32xf32>
    %c0_15 = arith.constant 0 : index
    %c0_16 = arith.constant 0 : index
    %26 = vector.load %arg6[%c0_15, %c0_16] : memref<1x32xf32, #tpu.memory_space<vmem>>, vector<1x32xf32>
    %27 = vector.broadcast %26 : vector<1x32xf32> to vector<16x32xf32>
    %28 = arith.addf %25, %27 : vector<16x32xf32>
    %cst_17 = arith.constant 0.000000e+00 : f32
    %29 = vector.broadcast %cst_17 : f32 to vector<16x32xf32>
    %30 = arith.maximumf %28, %29 : vector<16x32xf32>
    %31 = arith.truncf %30 : vector<16x32xf32> to vector<16x32xbf16>
    %c0_18 = arith.constant 0 : index
    %c0_19 = arith.constant 0 : index
    %32 = vector.load %arg7[%c0_18, %c0_19] : memref<32x16xbf16, #tpu.memory_space<vmem>>, vector<32x16xbf16>
    %cst_20 = arith.constant dense<0.000000e+00> : vector<16x16xf32>
    %33 = tpu.matmul %31, %32, %cst_20 {dimension_numbers = #tpu.dot_dimension_numbers<[1], [0], [0], [1], [0, 0, 1, 1], [], []>} : vector<16x32xbf16>, vector<32x16xbf16>, vector<16x16xf32> -> vector<16x16xf32>
    %c0_21 = arith.constant 0 : index
    %c0_22 = arith.constant 0 : index
    %34 = vector.load %arg8[%c0_21, %c0_22] : memref<1x16xf32, #tpu.memory_space<vmem>>, vector<1x16xf32>
    %35 = vector.broadcast %34 : vector<1x16xf32> to vector<16x16xf32>
    %36 = arith.addf %33, %35 : vector<16x16xf32>
    %cst_23 = arith.constant 0.000000e+00 : f32
    %37 = vector.broadcast %cst_23 : f32 to vector<16x16xf32>
    %38 = arith.maximumf %36, %37 : vector<16x16xf32>
    %c0_24 = arith.constant 0 : index
    %c0_25 = arith.constant 0 : index
    %39 = vector.load %arg10[%c0_24, %c0_25] : memref<1x16xf32, #tpu.memory_space<vmem>>, vector<1x16xf32>
    %40 = vector.broadcast %39 : vector<1x16xf32> to vector<16x16xf32>
    %41 = arith.mulf %38, %40 : vector<16x16xf32>
    %cst_26 = arith.constant dense<0.000000e+00> : vector<16xf32>
    %42 = vector.multi_reduction <add>, %41, %cst_26 [1] : vector<16x16xf32> to vector<16xf32>
    %43 = vector.shape_cast %42 : vector<16xf32> to vector<16x1xf32>
    %44 = arith.addf %12, %43 : vector<16x1xf32>
    %45 = tpu.transpose %44, [1, 0] : vector<16x1xf32> -> vector<1x16xf32>
    %c0_27 = arith.constant 0 : index
    %c0_28 = arith.constant 0 : index
    %46 = vector.load %arg11[%c0_27, %c0_28] : memref<1x1xf32, #tpu.memory_space<vmem>>, vector<1x1xf32>
    %47 = vector.broadcast %46 : vector<1x1xf32> to vector<1x16xf32>
    %48 = arith.addf %45, %47 : vector<1x16xf32>
    %49 = arith.negf %48 : vector<1x16xf32>
    %50 = math.exp %49 : vector<1x16xf32>
    %cst_29 = arith.constant 1.000000e+00 : f32
    %51 = vector.broadcast %cst_29 : f32 to vector<1x16xf32>
    %52 = arith.addf %51, %50 : vector<1x16xf32>
    %53 = arith.divf %51, %52 : vector<1x16xf32>
    %c0_30 = arith.constant 0 : index
    %c0_31 = arith.constant 0 : index
    %54 = vector.load %arg12[%c0_30, %c0_31] : memref<1x16xf32, #tpu.memory_space<vmem>>, vector<1x16xf32>
    tpu.vector_store %arg12[%c0_30, %c0_31], %53 {strides = array<i32>} : memref<1x16xf32, #tpu.memory_space<vmem>>, vector<1x16xf32>,
    return
  }
  func.func @transform_0(%arg0: i32) -> (i32, i32) {
    %c0_i32 = arith.constant 0 : i32
    %c0_i32_0 = arith.constant 0 : i32
    return %arg0, %c0_i32 : i32, i32
  }
  func.func @transform_1(%arg0: i32) -> (i32, i32) {
    %c0_i32 = arith.constant 0 : i32
    %c0_i32_0 = arith.constant 0 : i32
    %c0_i32_1 = arith.constant 0 : i32
    return %c0_i32, %c0_i32_0 : i32, i32
  }
  func.func @transform_2(%arg0: i32) -> (i32, i32) {
    %c0_i32 = arith.constant 0 : i32
    %c0_i32_0 = arith.constant 0 : i32
    %c0_i32_1 = arith.constant 0 : i32
    return %c0_i32, %c0_i32_0 : i32, i32
  }
  func.func @transform_3(%arg0: i32) -> (i32, i32) {
    %c0_i32 = arith.constant 0 : i32
    %c0_i32_0 = arith.constant 0 : i32
    %c0_i32_1 = arith.constant 0 : i32
    return %c0_i32, %c0_i32_0 : i32, i32
  }
  func.func @transform_4(%arg0: i32) -> (i32, i32) {
    %c0_i32 = arith.constant 0 : i32
    %c0_i32_0 = arith.constant 0 : i32
    %c0_i32_1 = arith.constant 0 : i32
    return %c0_i32, %c0_i32_0 : i32, i32
  }
  func.func @transform_5(%arg0: i32) -> (i32, i32) {
    %c0_i32 = arith.constant 0 : i32
    %c0_i32_0 = arith.constant 0 : i32
    %c0_i32_1 = arith.constant 0 : i32
    return %c0_i32, %c0_i32_0 : i32, i32
  }
  func.func @transform_6(%arg0: i32) -> (i32, i32) {
    %c0_i32 = arith.constant 0 : i32
    %c0_i32_0 = arith.constant 0 : i32
    %c0_i32_1 = arith.constant 0 : i32
    return %c0_i32, %c0_i32_0 : i32, i32
  }
  func.func @transform_7(%arg0: i32) -> (i32, i32) {
    %c0_i32 = arith.constant 0 : i32
    %c0_i32_0 = arith.constant 0 : i32
    %c0_i32_1 = arith.constant 0 : i32
    return %c0_i32, %c0_i32_0 : i32, i32
  }
  func.func @transform_8(%arg0: i32) -> (i32, i32) {
    %c0_i32 = arith.constant 0 : i32
    %c0_i32_0 = arith.constant 0 : i32
    %c0_i32_1 = arith.constant 0 : i32
    return %c0_i32, %c0_i32_0 : i32, i32
  }
  func.func @transform_9(%arg0: i32) -> (i32, i32) {
    %c0_i32 = arith.constant 0 : i32
    %c0_i32_0 = arith.constant 0 : i32
    %c0_i32_1 = arith.constant 0 : i32
    return %c0_i32, %c0_i32_0 : i32, i32
  }
  func.func @transform_10(%arg0: i32) -> (i32, i32) {
    %c0_i32 = arith.constant 0 : i32
    %c0_i32_0 = arith.constant 0 : i32
    %c0_i32_1 = arith.constant 0 : i32
    return %c0_i32, %c0_i32_0 : i32, i32
  }
  func.func @transform_11(%arg0: i32) -> (i32, i32) {
    %c0_i32 = arith.constant 0 : i32
    %c0_i32_0 = arith.constant 0 : i32
    return %c0_i32, %arg0 : i32, i32
  }
}

</mosaic_0001>

<bundles_post_ra>
// kernel: tpu_custom_call.1
= control target key start
LH: loop header
LB: loop body
LE: loop exit
PB: predicated region body
PF: predicated region fallthrough
CT: control target
= control target key end

     0   :  { %s725_s0 = inlined_call_operand.vmem [shape: bf16[16,120], index: 0, kind: input, shape index: {}]   ;;  %s726_s1 = inlined_call_operand.vmem [shape: bf16[30,64], index: 1, kind: input, shape index: {}]   ;;  %s727_s2 = inlined_call_operand.vmem [shape: bf16[30,64], index: 2, kind: input, shape index: {}]   ;;  %s728_s3 = inlined_call_operand.vmem [shape: f32[1,64], index: 3, kind: input, shape index: {}]   ;;  %s729_s4 = inlined_call_operand.vmem [shape: bf16[64,32], index: 4, kind: input, shape index: {}]   ;;  %s730_s5 = inlined_call_operand.vmem [shape: f32[1,32], index: 5, kind: input, shape index: {}]   ;;  %s731_s6 = inlined_call_operand.vmem [shape: bf16[32,16], index: 6, kind: input, shape index: {}]   ;;  %s732_s7 = inlined_call_operand.vmem [shape: f32[1,16], index: 7, kind: input, shape index: {}]   ;;  %s733_s8 = inlined_call_operand.vmem [shape: f32[1,30], index: 8, kind: input, shape index: {}]   ;;  %s734_s9 = inlined_call_operand.vmem [shape: f32[1,16], index: 9, kind: input, shape index: {}]   ;;  %s735_s10 = inlined_call_operand.<no memory space> [shape: f32[1,1], index: 10, kind: input, shape index: {}]   ;;  %s736_s11 = inlined_call_operand.hbm [shape: f32[1,16], index: 11, kind: output, shape index: {}]  }
   0x1   :  { %v16_v0 = vstv %s735_s10 }
   0x2   :  { %17 = vst [vmem:[#allocation2] sm:$0x1] %v16_v0 }
   0x3   :  { %v649_v1 = vld [vmem:[%s725_s0] sm:$0xff]   ;;  %v576_v2 = vmov 0.0   ;;  %v539_v3 = vld [vmem:[%s727_s2 + $0x8] sm:$0x7f]   ;;  %vm101_vm0 = vcmask 1046528   ;;  %s577_s23 = smov 38  }
   0x4   :  { %493 = vmatprep.subr.bf16.mxu0 %v576_v2  ;;  %501 = vmatprep.subr.bf16.mxu1 %v576_v2  ;;  %v103_v4 = vsel %vm101_vm0, %v539_v3, 0  ;;  %v541_v5 = vld [vmem:[%s726_s1 + $0x8] sm:$0x7f]   ;;  %v540_v6 = vld [vmem:[%s727_s2] sm:$0xff]   ;;  %vm578_vm1 = vmmov 0   ;;  %s579_s28 = smov 98  }
   0x5   :  { %85 = vrot.lane.b32.xlu0 %v649_v1, %s577_s23  ;;  %494 = vmatpush3.bf16.msra.mxu0 %v103_v4  ;;  %v163_v7 = vsel %vm101_vm0, %v541_v5, 0  ;;  %v542_v8 = vld [vmem:[%s726_s1] sm:$0xff]  }
   0x6   :  { %497 = vmatprep.mubr.msk.bf16.mxu0 %vm578_vm1, %v576_v2  ;;  %495 = vmatprep.subr.bf16.mxu0 %v576_v2 }
   0x7   :  { %505 = vmatprep.mubr.msk.bf16.mxu1 %vm578_vm1, %v576_v2  ;;  %502 = vmatpush3.bf16.msra.mxu1 %v163_v7 }
   0x8   :  { %503 = vmatprep.subr.bf16.mxu1 %v576_v2 }
   0x9   :  { %146 = vrot.lane.b32.xlu0 %v649_v1, %s579_s28  ;;  %496 = vmatpush3.bf16.msra.mxu0 %v540_v6 }
   0xa   :  { %509 = vmatprep.subr.bf16.mxu0 %v576_v2 }
   0xb   :  { %18 = vsyncpa [#allocation4], 0  ;;  %504 = vmatpush3.bf16.msra.mxu1 %v542_v8  ;;  %vm65_vm2 = vcmask 244736   ;;  %v543_v11 = vld [vmem:[%s729_s4 + $0x18] sm:$0xff]   ;;  %v544_v12 = vld [vmem:[%s729_s4 + $0x10] sm:$0xff]   ;;  %vm257_vm3 = vcmask 523264   ;;  %v44_v33 = vunpack.c.l.bf16 %v649_v1  ;;  %v45_v34 = vunpack.c.h.bf16 %v649_v1 }
   0xc   :  { %521 = vmatprep.subr.bf16.mxu1 %v576_v2  ;;  %v545_v13 = vld [vmem:[%s729_s4 + $0x8] sm:$0xff]   ;;  %v546_v14 = vld [vmem:[%s729_s4] sm:$0xff]   ;;  %s580_s20 = smov 68   ;;  %vm328_vm4 = vcmask 261120   ;;  %vm384_vm5 = vcmask 130048   ;;  %v581_v4 = vmov 0  }
   0xd   :  { %v466_v20 = vld [vmem:[%s728_s3] ss:$0 sm:$0xff]  ;;  %v547_v31 = vld [vmem:[%s731_s6 + $0x8] sm:$0xff]   ;;  %48 = vrot.lane.b32.xlu1 %v44_v33, %s580_s20  ;;  %vm442_vm6 = vcmask 122880  }
   0xe   :  { %v548_v32 = vld [vmem:[%s731_s6] sm:$0xff]   ;;  %536 = vset.pattern.permute.xlu1 %v581_v4 }
   0xf   :  { %v467_v35 = vld [vmem:[%s730_s5] ss:$0 sm:$0xff] }
  0x10   :  { %v458_v47 = vld [vmem:[%s733_s8] ss:$0 sm:$0xff] }
  0x11   :  { %50 = vrot.lane.b32.xlu1 %v45_v34, %s580_s20  ;;  %v473_v54 = vld [vmem:[%s732_s7] ss:$0 sm:$0xff]  ;;  %s582_s7 = smov [#allocation3]  }
  0x12   :  { %v477_v58 = vld [vmem:[%s734_s9] ss:$0 sm:$0xff]  ;;  %s450_s8 = sshll.u32 %s582_s7, 4  ;;  %s451_s8 = int_to_ptr.vmem [resolvable:$true] %s450_s8 }
  0x13   :  { %v425_v5 = vld [vmem:[#allocation2] sm:$0x1]  ;;  %s554_s9 = scalar_lea.vmem %s451_s8, 16  ;;  %s558_s25 = scalar_lea.vmem %s451_s8, 32 }
  0x14   :  { %p555_p0 = scmp.ne.s32.totalorder %s451_s8, %s554_s9  ;;  %p559_p1 = scmp.lt.s32.totalorder %s451_s8, %s451_s8 }
  0x15   :  { %p560_p2 = scmp.lt.s32.totalorder %s558_s25, %s554_s9 }
  0x17   :  { %p561_p3 = por %p560_p2, %p559_p1 }
  0x19   :  { %p562_p4 = pnand %p561_p3, %p555_p0 }
  0x77   :  { %v86_v9 = vpop.permute.xlu0 %85 }
  0x78   :  { %498 = vmatmul.mubr.msk.bf16.vlgmr.msra.gmra.mxu0 %vm65_vm2, %v86_v9 }
  0x79   :  { %517 = vmatprep.mubr.msk.bf16.mxu0 %vm578_vm1, %v576_v2  ;;  %510 = vmatpush3.bf16.msra.mxu0 %v543_v11 }
  0x7a   :  { %511 = vmatprep.subr.bf16.mxu0 %v576_v2 }
  0x7b   :  { %v147_v10 = vpop.permute.xlu0 %146 }
  0x7c   :  { %506 = vmatmul.mubr.msk.bf16.vlgmr.msra.gmra.mxu1 %vm65_vm2, %v147_v10 }
  0x7d   :  { %525 = vmatprep.mubr.msk.bf16.mxu1 %vm578_vm1, %v576_v2  ;;  %512 = vmatpush3.bf16.msra.mxu0 %v544_v12  ;;  %v431_v12 = vlaneseq }
  0x7e   :  { %513 = vmatprep.subr.bf16.mxu0 %v576_v2  ;;  %522 = vmatpush3.bf16.msra.mxu1 %v547_v31 }
  0x7f   :  { %523 = vmatprep.subr.bf16.mxu1 %v576_v2  ;;  %v49_v45 = vpop.permute.xlu1 %48 }
  0x80   :  { %v54_v46 = vmul.f32 %v49_v45, %v44_v33 }
  0x81   :  { %514 = vmatpush3.bf16.msra.mxu0 %v545_v13  ;;  %v432_v13 = vshrl.u32 %v431_v12, 7 }
  0x82   :  { %515 = vmatprep.subr.bf16.mxu0 %v576_v2  ;;  %524 = vmatpush3.bf16.msra.mxu1 %v548_v32  ;;  %v63_v48 = vmul.f32 %v458_v47, %v54_v46 }
  0x83   :  { %v51_v49 = vpop.permute.xlu1 %50 }
  0x84   :  { %v55_v50 = vmul.f32 %v51_v49, %v45_v34  ;;  %v66_v51 = vsel %vm65_vm2, %v63_v48, 0.0 }
  0x85   :  { %516 = vmatpush3.bf16.msra.mxu0 %v546_v14  ;;  %67 = vadd.xlane.f32.xlu0 %v66_v51  ;;  %v433_v14 = vsub.s32 0, %v432_v13 }
  0x86   :  { %v64_v52 = vmul.f32 %v458_v47, %v55_v50 }
  0x88   :  { %v69_v53 = vsel %vm65_vm2, %v64_v52, 0.0 }
  0x89   :  { %70 = vadd.xlane.f32.xlu0 %v69_v53 }
 0x10e   :  { %v68_v6 = vpop.xlane.xlu0 %67 }
 0x112   :  { %v71_v7 = vpop.xlane.xlu0 %70 }
 0x138   :  { %v139_v15 = vpop.f32.mrf.mxu0 }
 0x13a   :  { %v499_v16 = vpop.f32.mrf.mxu0 }
 0x13c   :  { %v142_v17 = vpop.f32.mrf.mxu0  ;;  %v199_v18 = vpop.f32.mrf.mxu1 }
 0x13d   :  { %v200_v19 = vadd.f32 %v199_v18, %v139_v15 }
 0x13e   :  { %v500_v21 = vpop.f32.mrf.mxu0  ;;  %v507_v22 = vpop.f32.mrf.mxu1 }
 0x13f   :  { %v213_v24 = vadd.f32 %v466_v20, %v200_v19 }
 0x140   :  { %v202_v23 = vpop.f32.mrf.mxu1 }
 0x141   :  { %v203_v25 = vadd.f32 %v202_v23, %v142_v17  ;;  %v215_v28 = vmax.f32 %v213_v24, 0.0 }
 0x142   :  { %v508_v26 = vpop.f32.mrf.mxu1 }
 0x143   :  { %v214_v27 = vadd.f32 %v466_v20, %v203_v25 }
 0x145   :  { %v216_v29 = vmax.f32 %v214_v27, 0.0 }
 0x147   :  { %v217_v30 = vpack.c.bf16 %v216_v29, %v215_v28 }
 0x149   :  { %518 = vmatmul.mubr.msk.bf16.vlgmr.msra.gmra.mxu0 %vm257_vm3, %v217_v30 }
 0x209   :  { %v295_v36 = vpop.f32.mrf.mxu0 }
 0x20a   :  { %v296_v38 = vadd.f32 %v467_v35, %v295_v36 }
 0x20b   :  { %v519_v37 = vpop.f32.mrf.mxu0 }
 0x20c   :  { %v302_v42 = vmax.f32 %v296_v38, 0.0 }
 0x20d   :  { %v298_v39 = vpop.f32.mrf.mxu0 }
 0x20e   :  { %v299_v40 = vadd.f32 %v467_v35, %v298_v39 }
 0x20f   :  { %v520_v41 = vpop.f32.mrf.mxu0 }
 0x210   :  { %v303_v43 = vmax.f32 %v299_v40, 0.0 }
 0x212   :  { %v304_v44 = vpack.c.bf16 %v303_v43, %v302_v42 }
 0x214   :  { %526 = vmatmul.mubr.msk.bf16.vlgmr.msra.gmra.mxu1 %vm328_vm4, %v304_v44 }
 0x2d4   :  { %v366_v55 = vpop.f32.mrf.mxu1 }
 0x2d5   :  { %v367_v56 = vadd.f32 %v473_v54, %v366_v55 }
 0x2d6   :  { %v527_v57 = vpop.f32.mrf.mxu1 }
 0x2d7   :  { %v373_v59 = vmax.f32 %v367_v56, 0.0 }
 0x2d8   :  { %v369_v60 = vpop.f32.mrf.mxu1 }
 0x2d9   :  { %v370_v61 = vadd.f32 %v473_v54, %v369_v60  ;;  %v382_v62 = vmul.f32 %v477_v58, %v373_v59 }
 0x2da   :  { %v528_v63 = vpop.f32.mrf.mxu1 }
 0x2db   :  { %v374_v0 = vmax.f32 %v370_v61, 0.0  ;;  %v385_v1 = vsel %vm384_vm5, %v382_v62, 0.0 }
 0x2dc   :  { %386 = vadd.xlane.f32.xlu1 %v385_v1 }
 0x2dd   :  { %v383_v2 = vmul.f32 %v477_v58, %v374_v0 }
 0x2df   :  { %v388_v3 = vsel %vm384_vm5, %v383_v2, 0.0 }
 0x2e0   :  { %389 = vadd.xlane.f32.xlu0 %v388_v3 }
 0x2ed   :  { %428 = vperm.xlu1 %536, %v425_v5  }
 0x365   :  { %v387_v8 = vpop.xlane.xlu1 %386 }
 0x366   :  { %v391_v9 = vadd.f32 %v387_v8, %v68_v6 }
 0x368   :  { %393 = vxpose.xlu0.b32.start [1/2] (short) (narrow) %v391_v9, 8 }
 0x369   :  { %v390_v10 = vpop.xlane.xlu0 %389  ;;  %v429_v15 = vpop.permute.xlu1 %428 }
 0x36a   :  { %v392_v11 = vadd.f32 %v390_v10, %v71_v7  ;;  %v434_v16 = vrot.slane %v429_v15, %v433_v14 }
 0x36c   :  { %394 = vxpose.xlu0.b32.end [2/2] (short) (narrow) %v392_v11, 8 }
 0x395   :  { %537 = vset.pattern.permute.xlu0 %v581_v4 }
 0x3e4   :  { %v409_v17 = vpop.trf.xlu0 }
 0x3e5   :  { %v435_v18 = vadd.f32 %v434_v16, %v409_v17 }
 0x3e7   :  { %v478_v19 = vmul.f32 -1.442695, %v435_v18 }
 0x3e9   :  { %550 = vpow2.f32 %v478_v19 }
 0x3f6   :  { %v551_v20 = vpop.eup %550 }
 0x3f7   :  { %v439_v21 = vadd.f32 1.0, %v551_v20 }
 0x3f9   :  { %552 = vrcp.f32 %v439_v21 }
 0x406   :  { %v553_v22 = vpop.eup %552 }
 0x407   :  { %443 = vst.msk [vmem:[#allocation3] sm:$0x1] %vm442_vm6, %v553_v22 }
 0x408   :  { %565 = shalt.err (!%p562_p4)
}
 0x409   :  { %453 = dma.vmem_to_hbm [thread:$0]  %s451_s8, 16, %s736_s11, [#allocation4]  }
 0x40a   :  { %574 = dma.done.wait [#allocation4], 16  }
 0x40b   :  { %575 = vsyncadd [#allocation4], 4294967280 }
 0x40c   :  { %457 = vsyncpa [#allocation4], 1 }

</bundles_post_ra>
